<compile_context>
chip_gen: v7x
topology: tpu7x:2x2x1
jax: 0.10.0
libtpu: 0.0.40
codegen_flags: <defaults>
</compile_context>

<pallas_src>
import functools

import jax
import jax.numpy as jnp
from jax import lax
from jax.experimental import pallas as pl
from jax.experimental.pallas import tpu as pltpu

# Set to jnp.bfloat16 on v6e/v7x for ~2x MXU throughput / half the HBM bytes
# (f32 accumulation and f32 bias/residual/ReLU math are kept either way).
MATMUL_DTYPE = jnp.float32


def _round_up(x, m):
    return (x + m - 1) // m * m


def _build_patch9(a, masks, patch_ref, W, C):
    """Write the 9 shifted 3x3-conv taps of `a` into VMEM scratch.

    a:         (C, LANES)   activation (C is sublane-tile aligned).
    masks:     (9, LANES)   {0,1} masks implementing zero padding / image seams.
    patch_ref: (9*C, LANES) VMEM scratch; tap t lands at rows [t*C, (t+1)*C).
    Shifts are XLU lane rotations; stores are tile-aligned (no relayouts).
    """
    LANES = a.shape[1]
    t = 0
    for dh in (-1, 0, 1):
        for dw in (-1, 0, 1):
            if dh == 0 and dw == 0:
                patch_ref[t * C:(t + 1) * C, :] = a            # center tap
            else:
                shift = (-(dh * W + dw)) % LANES
                rolled = pltpu.roll(a, shift=shift, axis=1)
                patch_ref[t * C:(t + 1) * C, :] = rolled * masks[t:t + 1, :]
            t += 1


def basic_block_kernel(x_ref, mask_ref, w1_ref, b1_ref, w2_ref, b2_ref,
                       out_ref, patch_ref, *, W, C):
    x = x_ref[0]                                      # (C, LANES) — also residual
    masks = mask_ref[...]                             # (9, LANES)

    # --- conv1 (+ folded bn1 scale) as one MXU matmul -> +bias -> relu ---
    _build_patch9(x, masks, patch_ref, W, C)
    h1 = jnp.dot(w1_ref[...], patch_ref[...],
                 preferred_element_type=jnp.float32)  # (C, LANES) f32
    h1 = jnp.maximum(h1 + b1_ref[...], 0.0)

    # --- conv2 (+ folded bn2 scale) -> +bias -> +residual -> relu ---
    _build_patch9(h1.astype(patch_ref.dtype), masks, patch_ref, W, C)
    o = jnp.dot(w2_ref[...], patch_ref[...],
                preferred_element_type=jnp.float32)   # (C, LANES) f32
    o = o + b2_ref[...] + x.astype(jnp.float32)
    out_ref[0] = jnp.maximum(o, 0.0).astype(out_ref.dtype)


def _tap_masks(H, W, HWp):
    """(9, HWp) {0,1} masks: tap (dh,dw) valid iff pixel real and neighbor in-image."""
    p = jnp.arange(HWp, dtype=jnp.int32)
    h, w = p // W, p % W
    real = p < H * W
    rows = []
    for dh in (-1, 0, 1):
        for dw in (-1, 0, 1):
            rows.append(real & (h + dh >= 0) & (h + dh < H)
                        & (w + dw >= 0) & (w + dw < W))
    return jnp.stack(rows, axis=0).astype(jnp.float32)


def _fold_weight(w_hwio, scale, cin_p, cout_p):
    """HWIO 3x3 weight -> (cout_p, 9*cin_p), tap-major, BN scale folded in."""
    kh, kw, cin, cout = w_hwio.shape
    w = jnp.transpose(w_hwio, (3, 0, 1, 2)) * scale[:, None, None, None]
    w = jnp.pad(w, ((0, cout_p - cout), (0, 0), (0, 0), (0, cin_p - cin)))
    return w.reshape(cout_p, kh * kw * cin_p)


def _pick_lane_batch(N, HWp, target_lanes):
    """Largest B dividing N with B*HWp <= target_lanes, keeping >=2 grid steps."""
    best = 1
    for b in range(1, N + 1):
        if N % b:
            continue
        if b * HWp > max(target_lanes, HWp):
            continue
        if N >= 2 and N // b < 2:      # v7x: keep both TensorCores busy
            continue
        best = b
    return best


def basic_block_forward(x_nchw, params, *, target_lanes=4096):
    """BasicBlock forward (stride=1, no downsample, no SE). NCHW in / NCHW out."""
    N, Cin, H, W = x_nchw.shape
    HW = H * W
    w1, w2 = params["w1"], params["w2"]               # HWIO (3, 3, cin, cout)
    C1, C2 = w1.shape[-1], w2.shape[-1]
    assert C1 == Cin and C2 == Cin, \
        "stride=1 / no-downsample path requires inplanes == planes"

    sublane = 8 if MATMUL_DTYPE == jnp.float32 else 16
    Cp = _round_up(Cin, sublane)                      # tile-aligned channels
    HWp = _round_up(HW, 128)                          # lane-dense pixels

    # BN scale folded into conv weights; biases stay f32 for the epilogue.
    w9_1 = _fold_weight(w1, params["s1"], Cp, Cp).astype(MATMUL_DTYPE)
    w9_2 = _fold_weight(w2, params["s2"], Cp, Cp).astype(MATMUL_DTYPE)
    b1 = jnp.pad(params["b1"], (0, Cp - C1)).reshape(Cp, 1).astype(jnp.float32)
    b2 = jnp.pad(params["b2"], (0, Cp - C2)).reshape(Cp, 1).astype(jnp.float32)

    # Lane batching: B images side by side on the lane axis per grid step.
    B = _pick_lane_batch(N, HWp, target_lanes)
    chunks = N // B
    LANES = B * HWp

    masks = jnp.tile(_tap_masks(H, W, HWp), (1, B)).astype(MATMUL_DTYPE)

    # NCHW -> (chunks, Cp, B*HWp): channels on sublanes, image-batched lanes.
    x2 = x_nchw.reshape(N, Cin, HW).astype(jnp.float32)
    x2 = jnp.pad(x2, ((0, 0), (0, Cp - Cin), (0, HWp - HW)))
    x2 = (x2.reshape(chunks, B, Cp, HWp)
             .transpose(0, 2, 1, 3)
             .reshape(chunks, Cp, LANES)
             .astype(MATMUL_DTYPE))

    kernel = functools.partial(basic_block_kernel, W=W, C=Cp)
    out2 = pl.pallas_call(
        kernel,
        out_shape=jax.ShapeDtypeStruct((chunks, Cp, LANES), jnp.float32),
        grid=(chunks,),
        in_specs=[
            pl.BlockSpec((1, Cp, LANES), lambda n: (n, 0, 0)),   # activations
            pl.BlockSpec((9, LANES), lambda n: (0, 0)),          # tap masks
            pl.BlockSpec((Cp, 9 * Cp), lambda n: (0, 0)),        # conv1 weight (scaled)
            pl.BlockSpec((Cp, 1), lambda n: (0, 0)),             # bn1 bias
            pl.BlockSpec((Cp, 9 * Cp), lambda n: (0, 0)),        # conv2 weight (scaled)
            pl.BlockSpec((Cp, 1), lambda n: (0, 0)),             # bn2 bias
        ],
        out_specs=pl.BlockSpec((1, Cp, LANES), lambda n: (n, 0, 0)),
        scratch_shapes=[pltpu.VMEM((9 * Cp, LANES), MATMUL_DTYPE)],  # shared patch buffer
        compiler_params=pltpu.CompilerParams(
            dimension_semantics=("parallel",),        # v7x: shard steps over 2 TCs
            vmem_limit_bytes=32 * 1024 * 1024,        # safe on v5e/v6e/v7x
        ),
    )(x2, masks, w9_1, b1, w9_2, b2)

    # (chunks, Cp, B*HWp) -> NCHW, dropping channel / pixel padding.
    out = (out2.reshape(chunks, Cp, B, HWp)
               .transpose(0, 2, 1, 3)
               .reshape(N, Cp, HWp))
    return out[:, :C2, :HW].reshape(N, C2, H, W)


def init_params(key, inplanes, planes):
    """Deterministic synthetic parameters matching BasicBlock(inplanes, planes)."""
    ks = jax.random.split(key, 10)
    fan1 = inplanes * 9
    w1 = jax.random.normal(ks[0], (3, 3, inplanes, planes), jnp.float32) * (2.0 / fan1) ** 0.5
    fan2 = planes * 9
    w2 = jax.random.normal(ks[1], (3, 3, planes, planes), jnp.float32) * (2.0 / fan2) ** 0.5

    def make_bn(kset, c):
        gamma = 1.0 + 0.1 * jax.random.normal(kset[0], (c,), jnp.float32)
        beta = 0.1 * jax.random.normal(kset[1], (c,), jnp.float32)
        mean = 0.1 * jax.random.normal(kset[2], (c,), jnp.float32)
        var = jnp.abs(jax.random.normal(kset[3], (c,), jnp.float32)) + 0.5
        eps = 1e-5
        scale = gamma / jnp.sqrt(var + eps)
        bias = beta - mean * scale
        return scale, bias

    s1, b1 = make_bn(ks[2:6], planes)
    s2, b2 = make_bn(ks[6:10], planes)
    return dict(w1=w1, s1=s1, b1=b1, w2=w2, s2=s2, b2=b2)


def reference_forward(x_nchw, p):
    """Pure-JAX reference (NHWC convs) for correctness check."""
    x = jnp.transpose(x_nchw, (0, 2, 3, 1)).astype(jnp.float32)

    def conv3x3(h, w):
        return lax.conv_general_dilated(
            h, w, window_strides=(1, 1), padding=((1, 1), (1, 1)),
            dimension_numbers=("NHWC", "HWIO", "NHWC"))

    h = jnp.maximum(conv3x3(x, p["w1"]) * p["s1"] + p["b1"], 0.0)
    o = conv3x3(h, p["w2"]) * p["s2"] + p["b2"] + x
    o = jnp.maximum(o, 0.0)
    return jnp.transpose(o, (0, 3, 1, 2))


if __name__ == "__main__":
    # BasicBlock(inplanes=4, planes=4, stride=1, downsample=None, use_se=False)
    N, C, H, W = 2, 4, 16, 16
    key = jax.random.PRNGKey(0)
    kx, kp = jax.random.split(key)
    x = jax.random.normal(kx, (N, C, H, W), jnp.float32)
    params = init_params(kp, inplanes=C, planes=C)

    out = basic_block_forward(x, params)
    out = jax.block_until_ready(out)

    ref = reference_forward(x, params)
    assert out.shape == (N, C, H, W)
    assert jnp.allclose(out, ref, rtol=1e-3, atol=1e-3), "mismatch vs JAX reference"

    print("KERNEL_OK")
</pallas_src>

<mosaic_0001>
module attributes {stable_mosaic.version = 11 : i64} {
  func.func @basic_block_kernel(%arg0: i32, %arg1: memref<1x8x256xf32, #tpu.memory_space<vmem>>, %arg2: memref<9x256xf32, #tpu.memory_space<vmem>>, %arg3: memref<8x72xf32, #tpu.memory_space<vmem>>, %arg4: memref<8x1xf32, #tpu.memory_space<vmem>>, %arg5: memref<8x72xf32, #tpu.memory_space<vmem>>, %arg6: memref<8x1xf32, #tpu.memory_space<vmem>>, %arg7: memref<1x8x256xf32, #tpu.memory_space<vmem>>, %arg8: memref<72x256xf32, #tpu.memory_space<vmem>>) attributes {dimension_semantics = [#tpu.dimension_semantics<parallel>], iteration_bounds = array<i64: 2>, scalar_prefetch = 0 : i64, scratch_operands = 1 : i64, tpu.core_type = #tpu.core_type<tc>, window_params = [{transform_indices = @transform_0, window_bounds = array<i64: 1, 8, 256>}, {pipeline_mode = #tpu.pipeline_mode<synchronous>, transform_indices = @transform_1, window_bounds = array<i64: 9, 256>}, {pipeline_mode = #tpu.pipeline_mode<synchronous>, transform_indices = @transform_2, window_bounds = array<i64: 8, 72>}, {pipeline_mode = #tpu.pipeline_mode<synchronous>, transform_indices = @transform_3, window_bounds = array<i64: 8, 1>}, {pipeline_mode = #tpu.pipeline_mode<synchronous>, transform_indices = @transform_4, window_bounds = array<i64: 8, 72>}, {pipeline_mode = #tpu.pipeline_mode<synchronous>, transform_indices = @transform_5, window_bounds = array<i64: 8, 1>}, {transform_indices = @transform_6, window_bounds = array<i64: 1, 8, 256>}]} {
    %c0 = arith.constant 0 : index
    %c0_0 = arith.constant 0 : index
    %c0_1 = arith.constant 0 : index
    %0 = vector.load %arg1[%c0, %c0_0, %c0_1] : memref<1x8x256xf32, #tpu.memory_space<vmem>>, vector<1x8x256xf32>
    %1 = vector.shape_cast %0 : vector<1x8x256xf32> to vector<8x256xf32>
    %c0_2 = arith.constant 0 : index
    %c0_3 = arith.constant 0 : index
    %2 = vector.load %arg2[%c0_2, %c0_3] : memref<9x256xf32, #tpu.memory_space<vmem>>, vector<9x256xf32>
    %c17_i32 = arith.constant 17 : i32
    %3 = tpu.dynamic_rotate %1 by %c17_i32 dim 1 : vector<8x256xf32>, i32 -> vector<8x256xf32>
    %4 = vector.extract_strided_slice %2 {offsets = [0, 0], sizes = [1, 256], strides = [1, 1]} : vector<9x256xf32> to vector<1x256xf32>
    %5 = vector.broadcast %4 : vector<1x256xf32> to vector<8x256xf32>
    %6 = arith.mulf %3, %5 : vector<8x256xf32>
    %c0_4 = arith.constant 0 : index
    %c0_5 = arith.constant 0 : index
    %7 = vector.load %arg8[%c0_4, %c0_5] : memref<72x256xf32, #tpu.memory_space<vmem>>, vector<8x256xf32>
    tpu.vector_store %arg8[%c0_4, %c0_5], %6 {strides = array<i32>} : memref<72x256xf32, #tpu.memory_space<vmem>>, vector<8x256xf32>,
    %c16_i32 = arith.constant 16 : i32
    %8 = tpu.dynamic_rotate %1 by %c16_i32 dim 1 : vector<8x256xf32>, i32 -> vector<8x256xf32>
    %9 = vector.extract_strided_slice %2 {offsets = [1, 0], sizes = [1, 256], strides = [1, 1]} : vector<9x256xf32> to vector<1x256xf32>
    %10 = vector.broadcast %9 : vector<1x256xf32> to vector<8x256xf32>
    %11 = arith.mulf %8, %10 : vector<8x256xf32>
    %c8 = arith.constant 8 : index
    %c0_6 = arith.constant 0 : index
    %12 = vector.load %arg8[%c8, %c0_6] : memref<72x256xf32, #tpu.memory_space<vmem>>, vector<8x256xf32>
    tpu.vector_store %arg8[%c8, %c0_6], %11 {strides = array<i32>} : memref<72x256xf32, #tpu.memory_space<vmem>>, vector<8x256xf32>,
    %c15_i32 = arith.constant 15 : i32
    %13 = tpu.dynamic_rotate %1 by %c15_i32 dim 1 : vector<8x256xf32>, i32 -> vector<8x256xf32>
    %14 = vector.extract_strided_slice %2 {offsets = [2, 0], sizes = [1, 256], strides = [1, 1]} : vector<9x256xf32> to vector<1x256xf32>
    %15 = vector.broadcast %14 : vector<1x256xf32> to vector<8x256xf32>
    %16 = arith.mulf %13, %15 : vector<8x256xf32>
    %c16 = arith.constant 16 : index
    %c0_7 = arith.constant 0 : index
    %17 = vector.load %arg8[%c16, %c0_7] : memref<72x256xf32, #tpu.memory_space<vmem>>, vector<8x256xf32>
    tpu.vector_store %arg8[%c16, %c0_7], %16 {strides = array<i32>} : memref<72x256xf32, #tpu.memory_space<vmem>>, vector<8x256xf32>,
    %c1_i32 = arith.constant 1 : i32
    %18 = tpu.dynamic_rotate %1 by %c1_i32 dim 1 : vector<8x256xf32>, i32 -> vector<8x256xf32>
    %19 = vector.extract_strided_slice %2 {offsets = [3, 0], sizes = [1, 256], strides = [1, 1]} : vector<9x256xf32> to vector<1x256xf32>
    %20 = vector.broadcast %19 : vector<1x256xf32> to vector<8x256xf32>
    %21 = arith.mulf %18, %20 : vector<8x256xf32>
    %c24 = arith.constant 24 : index
    %c0_8 = arith.constant 0 : index
    %22 = vector.load %arg8[%c24, %c0_8] : memref<72x256xf32, #tpu.memory_space<vmem>>, vector<8x256xf32>
    tpu.vector_store %arg8[%c24, %c0_8], %21 {strides = array<i32>} : memref<72x256xf32, #tpu.memory_space<vmem>>, vector<8x256xf32>,
    %c32 = arith.constant 32 : index
    %c0_9 = arith.constant 0 : index
    %23 = vector.load %arg8[%c32, %c0_9] : memref<72x256xf32, #tpu.memory_space<vmem>>, vector<8x256xf32>
    tpu.vector_store %arg8[%c32, %c0_9], %1 {strides = array<i32>} : memref<72x256xf32, #tpu.memory_space<vmem>>, vector<8x256xf32>,
    %c255_i32 = arith.constant 255 : i32
    %24 = tpu.dynamic_rotate %1 by %c255_i32 dim 1 : vector<8x256xf32>, i32 -> vector<8x256xf32>
    %25 = vector.extract_strided_slice %2 {offsets = [5, 0], sizes = [1, 256], strides = [1, 1]} : vector<9x256xf32> to vector<1x256xf32>
    %26 = vector.broadcast %25 : vector<1x256xf32> to vector<8x256xf32>
    %27 = arith.mulf %24, %26 : vector<8x256xf32>
    %c40 = arith.constant 40 : index
    %c0_10 = arith.constant 0 : index
    %28 = vector.load %arg8[%c40, %c0_10] : memref<72x256xf32, #tpu.memory_space<vmem>>, vector<8x256xf32>
    tpu.vector_store %arg8[%c40, %c0_10], %27 {strides = array<i32>} : memref<72x256xf32, #tpu.memory_space<vmem>>, vector<8x256xf32>,
    %c241_i32 = arith.constant 241 : i32
    %29 = tpu.dynamic_rotate %1 by %c241_i32 dim 1 : vector<8x256xf32>, i32 -> vector<8x256xf32>
    %30 = vector.extract_strided_slice %2 {offsets = [6, 0], sizes = [1, 256], strides = [1, 1]} : vector<9x256xf32> to vector<1x256xf32>
    %31 = vector.broadcast %30 : vector<1x256xf32> to vector<8x256xf32>
    %32 = arith.mulf %29, %31 : vector<8x256xf32>
    %c48 = arith.constant 48 : index
    %c0_11 = arith.constant 0 : index
    %33 = vector.load %arg8[%c48, %c0_11] : memref<72x256xf32, #tpu.memory_space<vmem>>, vector<8x256xf32>
    tpu.vector_store %arg8[%c48, %c0_11], %32 {strides = array<i32>} : memref<72x256xf32, #tpu.memory_space<vmem>>, vector<8x256xf32>,
    %c240_i32 = arith.constant 240 : i32
    %34 = tpu.dynamic_rotate %1 by %c240_i32 dim 1 : vector<8x256xf32>, i32 -> vector<8x256xf32>
    %35 = vector.extract_strided_slice %2 {offsets = [7, 0], sizes = [1, 256], strides = [1, 1]} : vector<9x256xf32> to vector<1x256xf32>
    %36 = vector.broadcast %35 : vector<1x256xf32> to vector<8x256xf32>
    %37 = arith.mulf %34, %36 : vector<8x256xf32>
    %c56 = arith.constant 56 : index
    %c0_12 = arith.constant 0 : index
    %38 = vector.load %arg8[%c56, %c0_12] : memref<72x256xf32, #tpu.memory_space<vmem>>, vector<8x256xf32>
    tpu.vector_store %arg8[%c56, %c0_12], %37 {strides = array<i32>} : memref<72x256xf32, #tpu.memory_space<vmem>>, vector<8x256xf32>,
    %c239_i32 = arith.constant 239 : i32
    %39 = tpu.dynamic_rotate %1 by %c239_i32 dim 1 : vector<8x256xf32>, i32 -> vector<8x256xf32>
    %40 = vector.extract_strided_slice %2 {offsets = [8, 0], sizes = [1, 256], strides = [1, 1]} : vector<9x256xf32> to vector<1x256xf32>
    %41 = vector.broadcast %40 : vector<1x256xf32> to vector<8x256xf32>
    %42 = arith.mulf %39, %41 : vector<8x256xf32>
    %c64 = arith.constant 64 : index
    %c0_13 = arith.constant 0 : index
    %43 = vector.load %arg8[%c64, %c0_13] : memref<72x256xf32, #tpu.memory_space<vmem>>, vector<8x256xf32>
    tpu.vector_store %arg8[%c64, %c0_13], %42 {strides = array<i32>} : memref<72x256xf32, #tpu.memory_space<vmem>>, vector<8x256xf32>,
    %c0_14 = arith.constant 0 : index
    %c0_15 = arith.constant 0 : index
    %44 = vector.load %arg3[%c0_14, %c0_15] : memref<8x72xf32, #tpu.memory_space<vmem>>, vector<8x72xf32>
    %c0_16 = arith.constant 0 : index
    %c0_17 = arith.constant 0 : index
    %45 = vector.load %arg8[%c0_16, %c0_17] : memref<72x256xf32, #tpu.memory_space<vmem>>, vector<72x256xf32>
    %cst = arith.constant dense<0.000000e+00> : vector<8x256xf32>
    %46 = tpu.matmul %44, %45, %cst {dimension_numbers = #tpu.dot_dimension_numbers<[1], [0], [0], [1], [0, 0, 1, 1], [], []>} : vector<8x72xf32>, vector<72x256xf32>, vector<8x256xf32> -> vector<8x256xf32>
    %c0_18 = arith.constant 0 : index
    %c0_19 = arith.constant 0 : index
    %47 = vector.load %arg4[%c0_18, %c0_19] : memref<8x1xf32, #tpu.memory_space<vmem>>, vector<8x1xf32>
    %48 = vector.broadcast %47 : vector<8x1xf32> to vector<8x256xf32>
    %49 = arith.addf %46, %48 : vector<8x256xf32>
    %cst_20 = arith.constant 0.000000e+00 : f32
    %50 = vector.broadcast %cst_20 : f32 to vector<8x256xf32>
    %51 = arith.maximumf %49, %50 : vector<8x256xf32>
    %c17_i32_21 = arith.constant 17 : i32
    %52 = tpu.dynamic_rotate %51 by %c17_i32_21 dim 1 : vector<8x256xf32>, i32 -> vector<8x256xf32>
    %53 = vector.extract_strided_slice %2 {offsets = [0, 0], sizes = [1, 256], strides = [1, 1]} : vector<9x256xf32> to vector<1x256xf32>
    %54 = vector.broadcast %53 : vector<1x256xf32> to vector<8x256xf32>
    %55 = arith.mulf %52, %54 : vector<8x256xf32>
    %c0_22 = arith.constant 0 : index
    %c0_23 = arith.constant 0 : index
    %56 = vector.load %arg8[%c0_22, %c0_23] : memref<72x256xf32, #tpu.memory_space<vmem>>, vector<8x256xf32>
    tpu.vector_store %arg8[%c0_22, %c0_23], %55 {strides = array<i32>} : memref<72x256xf32, #tpu.memory_space<vmem>>, vector<8x256xf32>,
    %c16_i32_24 = arith.constant 16 : i32
    %57 = tpu.dynamic_rotate %51 by %c16_i32_24 dim 1 : vector<8x256xf32>, i32 -> vector<8x256xf32>
    %58 = vector.extract_strided_slice %2 {offsets = [1, 0], sizes = [1, 256], strides = [1, 1]} : vector<9x256xf32> to vector<1x256xf32>
    %59 = vector.broadcast %58 : vector<1x256xf32> to vector<8x256xf32>
    %60 = arith.mulf %57, %59 : vector<8x256xf32>
    %c8_25 = arith.constant 8 : index
    %c0_26 = arith.constant 0 : index
    %61 = vector.load %arg8[%c8_25, %c0_26] : memref<72x256xf32, #tpu.memory_space<vmem>>, vector<8x256xf32>
    tpu.vector_store %arg8[%c8_25, %c0_26], %60 {strides = array<i32>} : memref<72x256xf32, #tpu.memory_space<vmem>>, vector<8x256xf32>,
    %c15_i32_27 = arith.constant 15 : i32
    %62 = tpu.dynamic_rotate %51 by %c15_i32_27 dim 1 : vector<8x256xf32>, i32 -> vector<8x256xf32>
    %63 = vector.extract_strided_slice %2 {offsets = [2, 0], sizes = [1, 256], strides = [1, 1]} : vector<9x256xf32> to vector<1x256xf32>
    %64 = vector.broadcast %63 : vector<1x256xf32> to vector<8x256xf32>
    %65 = arith.mulf %62, %64 : vector<8x256xf32>
    %c16_28 = arith.constant 16 : index
    %c0_29 = arith.constant 0 : index
    %66 = vector.load %arg8[%c16_28, %c0_29] : memref<72x256xf32, #tpu.memory_space<vmem>>, vector<8x256xf32>
    tpu.vector_store %arg8[%c16_28, %c0_29], %65 {strides = array<i32>} : memref<72x256xf32, #tpu.memory_space<vmem>>, vector<8x256xf32>,
    %c1_i32_30 = arith.constant 1 : i32
    %67 = tpu.dynamic_rotate %51 by %c1_i32_30 dim 1 : vector<8x256xf32>, i32 -> vector<8x256xf32>
    %68 = vector.extract_strided_slice %2 {offsets = [3, 0], sizes = [1, 256], strides = [1, 1]} : vector<9x256xf32> to vector<1x256xf32>
    %69 = vector.broadcast %68 : vector<1x256xf32> to vector<8x256xf32>
    %70 = arith.mulf %67, %69 : vector<8x256xf32>
    %c24_31 = arith.constant 24 : index
    %c0_32 = arith.constant 0 : index
    %71 = vector.load %arg8[%c24_31, %c0_32] : memref<72x256xf32, #tpu.memory_space<vmem>>, vector<8x256xf32>
    tpu.vector_store %arg8[%c24_31, %c0_32], %70 {strides = array<i32>} : memref<72x256xf32, #tpu.memory_space<vmem>>, vector<8x256xf32>,
    %c32_33 = arith.constant 32 : index
    %c0_34 = arith.constant 0 : index
    %72 = vector.load %arg8[%c32_33, %c0_34] : memref<72x256xf32, #tpu.memory_space<vmem>>, vector<8x256xf32>
    tpu.vector_store %arg8[%c32_33, %c0_34], %51 {strides = array<i32>} : memref<72x256xf32, #tpu.memory_space<vmem>>, vector<8x256xf32>,
    %c255_i32_35 = arith.constant 255 : i32
    %73 = tpu.dynamic_rotate %51 by %c255_i32_35 dim 1 : vector<8x256xf32>, i32 -> vector<8x256xf32>
    %74 = vector.extract_strided_slice %2 {offsets = [5, 0], sizes = [1, 256], strides = [1, 1]} : vector<9x256xf32> to vector<1x256xf32>
    %75 = vector.broadcast %74 : vector<1x256xf32> to vector<8x256xf32>
    %76 = arith.mulf %73, %75 : vector<8x256xf32>
    %c40_36 = arith.constant 40 : index
    %c0_37 = arith.constant 0 : index
    %77 = vector.load %arg8[%c40_36, %c0_37] : memref<72x256xf32, #tpu.memory_space<vmem>>, vector<8x256xf32>
    tpu.vector_store %arg8[%c40_36, %c0_37], %76 {strides = array<i32>} : memref<72x256xf32, #tpu.memory_space<vmem>>, vector<8x256xf32>,
    %c241_i32_38 = arith.constant 241 : i32
    %78 = tpu.dynamic_rotate %51 by %c241_i32_38 dim 1 : vector<8x256xf32>, i32 -> vector<8x256xf32>
    %79 = vector.extract_strided_slice %2 {offsets = [6, 0], sizes = [1, 256], strides = [1, 1]} : vector<9x256xf32> to vector<1x256xf32>
    %80 = vector.broadcast %79 : vector<1x256xf32> to vector<8x256xf32>
    %81 = arith.mulf %78, %80 : vector<8x256xf32>
    %c48_39 = arith.constant 48 : index
    %c0_40 = arith.constant 0 : index
    %82 = vector.load %arg8[%c48_39, %c0_40] : memref<72x256xf32, #tpu.memory_space<vmem>>, vector<8x256xf32>
    tpu.vector_store %arg8[%c48_39, %c0_40], %81 {strides = array<i32>} : memref<72x256xf32, #tpu.memory_space<vmem>>, vector<8x256xf32>,
    %c240_i32_41 = arith.constant 240 : i32
    %83 = tpu.dynamic_rotate %51 by %c240_i32_41 dim 1 : vector<8x256xf32>, i32 -> vector<8x256xf32>
    %84 = vector.extract_strided_slice %2 {offsets = [7, 0], sizes = [1, 256], strides = [1, 1]} : vector<9x256xf32> to vector<1x256xf32>
    %85 = vector.broadcast %84 : vector<1x256xf32> to vector<8x256xf32>
    %86 = arith.mulf %83, %85 : vector<8x256xf32>
    %c56_42 = arith.constant 56 : index
    %c0_43 = arith.constant 0 : index
    %87 = vector.load %arg8[%c56_42, %c0_43] : memref<72x256xf32, #tpu.memory_space<vmem>>, vector<8x256xf32>
    tpu.vector_store %arg8[%c56_42, %c0_43], %86 {strides = array<i32>} : memref<72x256xf32, #tpu.memory_space<vmem>>, vector<8x256xf32>,
    %c239_i32_44 = arith.constant 239 : i32
    %88 = tpu.dynamic_rotate %51 by %c239_i32_44 dim 1 : vector<8x256xf32>, i32 -> vector<8x256xf32>
    %89 = vector.extract_strided_slice %2 {offsets = [8, 0], sizes = [1, 256], strides = [1, 1]} : vector<9x256xf32> to vector<1x256xf32>
    %90 = vector.broadcast %89 : vector<1x256xf32> to vector<8x256xf32>
    %91 = arith.mulf %88, %90 : vector<8x256xf32>
    %c64_45 = arith.constant 64 : index
    %c0_46 = arith.constant 0 : index
    %92 = vector.load %arg8[%c64_45, %c0_46] : memref<72x256xf32, #tpu.memory_space<vmem>>, vector<8x256xf32>
    tpu.vector_store %arg8[%c64_45, %c0_46], %91 {strides = array<i32>} : memref<72x256xf32, #tpu.memory_space<vmem>>, vector<8x256xf32>,
    %c0_47 = arith.constant 0 : index
    %c0_48 = arith.constant 0 : index
    %93 = vector.load %arg5[%c0_47, %c0_48] : memref<8x72xf32, #tpu.memory_space<vmem>>, vector<8x72xf32>
    %c0_49 = arith.constant 0 : index
    %c0_50 = arith.constant 0 : index
    %94 = vector.load %arg8[%c0_49, %c0_50] : memref<72x256xf32, #tpu.memory_space<vmem>>, vector<72x256xf32>
    %cst_51 = arith.constant dense<0.000000e+00> : vector<8x256xf32>
    %95 = tpu.matmul %93, %94, %cst_51 {dimension_numbers = #tpu.dot_dimension_numbers<[1], [0], [0], [1], [0, 0, 1, 1], [], []>} : vector<8x72xf32>, vector<72x256xf32>, vector<8x256xf32> -> vector<8x256xf32>
    %c0_52 = arith.constant 0 : index
    %c0_53 = arith.constant 0 : index
    %96 = vector.load %arg6[%c0_52, %c0_53] : memref<8x1xf32, #tpu.memory_space<vmem>>, vector<8x1xf32>
    %97 = vector.broadcast %96 : vector<8x1xf32> to vector<8x256xf32>
    %98 = arith.addf %95, %97 : vector<8x256xf32>
    %99 = arith.addf %98, %1 : vector<8x256xf32>
    %cst_54 = arith.constant 0.000000e+00 : f32
    %100 = vector.broadcast %cst_54 : f32 to vector<8x256xf32>
    %101 = arith.maximumf %99, %100 : vector<8x256xf32>
    %c0_55 = arith.constant 0 : index
    %c0_56 = arith.constant 0 : index
    %c0_57 = arith.constant 0 : index
    %102 = vector.load %arg7[%c0_55, %c0_56, %c0_57] : memref<1x8x256xf32, #tpu.memory_space<vmem>>, vector<1x8x256xf32>
    %103 = vector.shape_cast %102 : vector<1x8x256xf32> to vector<8x256xf32>
    %104 = vector.shape_cast %101 : vector<8x256xf32> to vector<1x8x256xf32>
    tpu.vector_store %arg7[%c0_55, %c0_56, %c0_57], %104 {strides = array<i32>} : memref<1x8x256xf32, #tpu.memory_space<vmem>>, vector<1x8x256xf32>,
    return
  }
  func.func @transform_0(%arg0: i32) -> (i32, i32, i32) {
    %c0_i32 = arith.constant 0 : i32
    %c0_i32_0 = arith.constant 0 : i32
    %c0_i32_1 = arith.constant 0 : i32
    return %arg0, %c0_i32, %c0_i32_0 : i32, i32, i32
  }
  func.func @transform_1(%arg0: i32) -> (i32, i32) {
    %c0_i32 = arith.constant 0 : i32
    %c0_i32_0 = arith.constant 0 : i32
    %c0_i32_1 = arith.constant 0 : i32
    return %c0_i32, %c0_i32_0 : i32, i32
  }
  func.func @transform_2(%arg0: i32) -> (i32, i32) {
    %c0_i32 = arith.constant 0 : i32
    %c0_i32_0 = arith.constant 0 : i32
    %c0_i32_1 = arith.constant 0 : i32
    return %c0_i32, %c0_i32_0 : i32, i32
  }
  func.func @transform_3(%arg0: i32) -> (i32, i32) {
    %c0_i32 = arith.constant 0 : i32
    %c0_i32_0 = arith.constant 0 : i32
    %c0_i32_1 = arith.constant 0 : i32
    return %c0_i32, %c0_i32_0 : i32, i32
  }
  func.func @transform_4(%arg0: i32) -> (i32, i32) {
    %c0_i32 = arith.constant 0 : i32
    %c0_i32_0 = arith.constant 0 : i32
    %c0_i32_1 = arith.constant 0 : i32
    return %c0_i32, %c0_i32_0 : i32, i32
  }
  func.func @transform_5(%arg0: i32) -> (i32, i32) {
    %c0_i32 = arith.constant 0 : i32
    %c0_i32_0 = arith.constant 0 : i32
    %c0_i32_1 = arith.constant 0 : i32
    return %c0_i32, %c0_i32_0 : i32, i32
  }
  func.func @transform_6(%arg0: i32) -> (i32, i32, i32) {
    %c0_i32 = arith.constant 0 : i32
    %c0_i32_0 = arith.constant 0 : i32
    %c0_i32_1 = arith.constant 0 : i32
    return %arg0, %c0_i32, %c0_i32_0 : i32, i32, i32
  }
}

</mosaic_0001>

<bundles_post_ra>
// kernel: tpu_custom_call.1
= control target key start
LH: loop header
LB: loop body
LE: loop exit
PB: predicated region body
PF: predicated region fallthrough
CT: control target
= control target key end

     0   :  { %11 = vsyncpa [#allocation4], 0  ;;  %s1579_s0 = inlined_call_operand.hbm [shape: f32[2,8,256], index: 0, kind: input, shape index: {}]   ;;  %s1580_s1 = inlined_call_operand.hbm [shape: f32[9,256], index: 1, kind: input, shape index: {}]   ;;  %s1581_s2 = inlined_call_operand.vmem [shape: f32[8,72], index: 2, kind: input, shape index: {}]   ;;  %s1582_s3 = inlined_call_operand.vmem [shape: f32[8,1], index: 3, kind: input, shape index: {}]   ;;  %s1583_s4 = inlined_call_operand.vmem [shape: f32[8,72], index: 4, kind: input, shape index: {}]   ;;  %s1584_s5 = inlined_call_operand.vmem [shape: f32[8,1], index: 5, kind: input, shape index: {}]   ;;  %s1585_s6 = inlined_call_operand.hbm [shape: f32[2,8,256], index: 6, kind: output, shape index: {}]  }
   0x1   :  { %13 = vsyncpa [#allocation4 + $0x1], 0 }
   0x2   :  { %14 = vsyncpa [#allocation7], 0 }
   0x3   :  { %15 = vsyncpa [#allocation5], 0 }
   0x4   :  { %17 = vsyncpa [#allocation5 + $0x1], 0  ;;  %s1133_s21 = smov 0   ;;  %s1135_s22 = smov 0  }
   0x5   :  { %s1137_s23 = smov 0   ;;  %s1139_s24 = smov 0  }
   0x6 LB: > { %s1154_s25 = sadd.s32 4294967295, %s1081_s24   ;;  %s829_s26 = sadd.s32 4294967294, %s1081_s24   ;;  %s1081_s24 = sphi %s1139_s24, %s1605_s24   ;;  %s1077_s23 = sphi %s1137_s23, %s1604_s23   ;;  %s1073_s22 = sphi %s1135_s22, %s1603_s22   ;;  %s1069_s21 = sphi %s1133_s21, %s1602_s21  }
   0x7   : > { %p43_p0 = scmp.ne.s32.totalorder %s1073_s22, %s1069_s21  ;;  %p1586_p1 = scmp.eq.s32.totalorder %s1154_s25, 0 }
   0x8   : > { %p178_p3 = scmp.eq.s32.totalorder %s829_s26, 1  ;;  %p830_p5 = scmp.ge.s32.totalorder %s1081_s24, 1 }
   0x9   : > { %p1163_p4 = por %p1586_p1, %p43_p0  ;;  %p185_p7 = scmp.lt.s32.totalorder %s1081_s24, 3 }
   0xa   : > { %p1168_p6 = por %p178_p3, %p43_p0  ;;  %s1083_s30 = smov [#allocation6]  }
   0xb   : > { %s1589_s27 = scalar_select %p1163_p4, 1, 0 }
   0xc   : > { %s1590_s28 = scalar_select %p1168_p6, 1, 0 }
   0xd   : > { %p1173_p8 = pnand %p830_p5, %p185_p7  ;;  %s197_s7 = sshll.u32 %s1083_s30, 4  ;;  %s1177_s7 = int_to_ptr.vmem [resolvable:$true] %s197_s7 }
   0xe   : > { %s1189_s9 = sadd.s32 1, %s1081_s24   ;;  %s30_s10 = sadd.s32 1, %s1077_s23 }
   0xf   : > { %s1591_s29 = scalar_select %p1173_p8, 1, 0 }
  0x10   : > { %p891_p9 = pneg %p1173_p8  ;;  %s27_s11 = ssub.s32 %s1081_s24, %s1189_s9 }
  0x11   : > { %s953_s14 = scalar_lea.hbm %s1580_s1, 512 }
  0x12   : > { %p1184_p11 = pnand %p891_p9, %p1586_p1  ;;  %p954_p12 = scmp.ne.s32.totalorder %s1580_s1, %s953_s14 }
  0x13   : > { %p960_p5 = scmp.lt.u32.totalorder %s953_s14, %s1580_s1 }
  0x14   : > { %p955_p13 = pneg %p1184_p11 }
  0x16   : > { %p956_p0 = pnand %p955_p13, %p954_p12 }
  0x18   : > { %p957_p3 = pneg %p956_p0 }
  0x1a   : > { %p962_p7 = pnand %p960_p5, %p957_p3 }
  0x1c   : > { %965 = shalt.err (!%p962_p7)
}
  0x1d   : > { %s966_s19 = scalar_lea.vmem %s1177_s7, 512  ;;  %p974_p2 = scmp.lt.s32.totalorder %s1177_s7, %s1177_s7 }
  0x1e   : > { %p967_p9 = scmp.ne.s32.totalorder %s1177_s7, %s966_s19  ;;  %p975_p6 = scmp.lt.s32.totalorder %s966_s19, %s966_s19 }
  0x20   : > { %p969_p10 = pnand %p967_p9, %p955_p13  ;;  %p976_p4 = por %p975_p6, %p974_p2 }
  0x22   : > { %p970_p1 = pneg %p969_p10 }
  0x24   : > { %p977_p8 = pnand %p976_p4, %p970_p1 }
  0x26   : > { %980 = shalt.err (!%p977_p8)
}
  0x27   : > { %s1084_s20 = smov 256   ;;  %s1085_s26 = smov 16  }
  0x28   : > { %894 = dma.hbm_to_vmem [thread:$0]  (!%p1184_p11), %s1580_s1, 512, %s1177_s7, [#allocation7], %s1084_s20, %s1084_s20, %s1085_s26  }
  0x29   : > { %p28_p2 = scmp.eq.s32.totalorder %s27_s11, 0  ;;  %p37_p1 = scmp.ne.s32.totalorder %s1077_s23, %s1073_s22 }
  0x2a   : > { %p38_p4 = scmp.eq.s32.totalorder %s1081_s24, 0  ;;  %p904_p6 = scmp.lt.s32.totalorder %s1081_s24, 2 }
  0x2b   : > { %s1220_s13 = scalar_select %p28_p2, %s1077_s23, %s30_s10  }
  0x2c   : > { %p39_p8 = por %p38_p4, %p37_p1  ;;  %p1593_p10 = scmp.eq.s32.totalorder %s1154_s25, 1 }
  0x2d   : > { %s223_s15 = sand.u32 1, %s1077_s23   ;;  %s849_s16 = sshll.u32 %s1081_s24, 8 }
  0x2e   : > { %p1224_p12 = por %p1593_p10, %p37_p1  ;;  %s833_s17 = sshll.u32 %s223_s15, 4 }
  0x2f   : > { %s1233_s19 = scalar_lea.hbm %s1579_s0, %s849_s16  ;;  %s227_s7 = scalar_lea.vmem [#allocation3], %s833_s17 }
  0x30   : > { %s235_s10 = sshll.u32 %s227_s7, 4  ;;  %p1235_p11 = pnand %p904_p6, %p39_p8  ;;  %s1239_s10 = int_to_ptr.vmem [resolvable:$true] %s235_s10 }
  0x31   : > { %s224_s20 = scalar_lea.sflag [#allocation4], %s223_s15  ;;  %s981_s26 = scalar_lea.hbm %s1233_s19, 256 }
  0x32   : > { %p982_p13 = scmp.ne.s32.totalorder %s1233_s19, %s981_s26  ;;  %p983_p0 = pneg %p1235_p11 }
  0x33   : > { %s986_s16 = scalar_lea.hbm %s1579_s0, 512  ;;  %p987_p7 = scmp.lt.u32.totalorder %s1233_s19, %s1579_s0 }
  0x34   : > { %p984_p3 = pnand %p983_p0, %p982_p13  ;;  %p988_p9 = scmp.lt.u32.totalorder %s986_s16, %s981_s26 }
  0x35   : > { %p990_p1 = scmp.lt.u32.totalorder %s981_s26, %s1233_s19 }
  0x36   : > { %p985_p5 = pneg %p984_p3  ;;  %p989_p2 = por %p988_p9, %p987_p7 }
  0x38   : > { %p991_p4 = por %p990_p1, %p989_p2 }
  0x3a   : > { %p992_p6 = pnand %p991_p4, %p985_p5 }
  0x3c   : > { %995 = shalt.err (!%p992_p6)
}
  0x3d   : > { %s996_s15 = scalar_lea.vmem %s1239_s10, 256  ;;  %s1086_s18 = smov [#allocation3]  }
  0x3e   : > { %p997_p8 = scmp.ne.s32.totalorder %s1239_s10, %s996_s15  ;;  %s1001_s7 = sshll.u32 %s1086_s18, 4  ;;  %s1002_s7 = int_to_ptr.vmem [resolvable:$false] %s1001_s7 }
  0x3f   : > { %s1003_s30 = scalar_lea.vmem %s1002_s7, 512  ;;  %p1004_p3 = scmp.lt.s32.totalorder %s1239_s10, %s1002_s7 }
  0x40   : > { %p999_p10 = pnand %p997_p8, %p983_p0  ;;  %p1005_p7 = scmp.lt.s32.totalorder %s1003_s30, %s996_s15 }
  0x42   : > { %p1000_p13 = pneg %p999_p10  ;;  %p1006_p9 = por %p1005_p7, %p1004_p3 }
  0x44   : > { %p1007_p2 = pnand %p1006_p9, %p1000_p13 }
  0x46   : > { %1010 = shalt.err (!%p1007_p2)
}
  0x47   : > { %898 = dma.hbm_to_vmem [thread:$0]  (!%p1235_p11), %s1233_s19, 256, %s1239_s10, %s224_s20  }
  0x48   : > { %p1596_p5 = scmp.ne.s32.totalorder %s1591_s29, 0 }
  0x49   : > { %s1269_s26 = sand.u32 (!%p1596_p5), 1, %s1073_s22   ;;  %p1597_p0 = scmp.ne.s32.totalorder (!%p1596_p5), %s1589_s27, 0 }
  0x4a   : > { %244 = sbr.rel (%p1596_p5) target bundleno = 839 (0x347), region = 44  ;;  %s837_s12 = sshll.u32 (!%p1596_p5), %s1269_s26, 4 }
  0x4b   : > { %s247_s16 = scalar_lea.sflag (!%p1596_p5), [#allocation4], %s1269_s26  ;;  %s250_s17 = scalar_lea.vmem (!%p1596_p5), [#allocation3], %s837_s12 }
  0x51   : > { %1056 = dma.done.wait (%p1597_p0), %s247_s16, 256  }
  0x52   : > { %1058 = vsyncadd (%p1597_p0), %s247_s16, 4294967040  ;;  %p1598_p11 = scmp.eq.s32.totalorder %s1154_s25, 0 }
  0x54   : > { %1060 = dma.done.wait (%p1598_p11), [#allocation7], 512   ;;  %p1599_p1 = pmov %p1598_p11 }
  0x55   : > { %v1283_v0 = vld [vmem:[%s250_s17] sm:$0xff]  ;;  %s1087_s29 = smov 16   ;;  %s1088_s19 = smov 17   ;;  %v1289_v1 = vld [vmem:[%s250_s17 + $0x8] sm:$0xff]  ;;  %v1093_v2 = vmov 0.0   ;;  %v1094_v3 = vmov 0   ;;  %v293_v5 = vlaneseq }
  0x56   : > { %1062 = vsyncadd (%p1599_p1), [#allocation7], 4294966784  ;;  %310 = vrot.lane.b32.xlu1 %v1283_v0, %s1087_s29  ;;  %289 = vrot.lane.b32.xlu0 %v1283_v0, %s1088_s19  ;;  %s1089_s27 = smov 15   ;;  %s1090_s10 = smov 1   ;;  %v464_v4 = vld [vmem:[%s1582_s3] sm:$0xff]  ;;  %v1330_v11 = vld [vmem:[#allocation6 + $0x8] sm:$0xff] }
  0x57   : > { %s1091_s11 = smov 127   ;;  %s1092_s20 = smov 113   ;;  %538 = vmatprep.mubr.f32.mxu0 %v1093_v2  ;;  %721 = vmatprep.mubr.f32.mxu1 %v1093_v2  ;;  %v1322_v6 = vshrl.u32 %v293_v5, 7  ;;  %v1324_v7 = vand.u32 127, %v293_v5  ;;  %v1328_v10 = vld [vmem:[#allocation6] sm:$0xff]  ;;  %vm470_vm8 = vcmask 588800  }
  0x58   : > { %952 = vset.pattern.permute.xlu0 %v1094_v3  ;;  %s1095_s8 = smov 112   ;;  %s1096_s15 = smov 111  }
  0x59   : > { %v319_v8 = vsub.s32 1, %v1322_v6  ;;  %v300_v9 = vsub.s32 0, %v1322_v6  ;;  %vm314_vm0 = vcmp.lt.s32.totalorder %v1324_v7, 16  ;;  %vm295_vm1 = vcmp.lt.s32.totalorder %v1324_v7, 17 }
  0x5a   : > { %312 = vrot.lane.b32.xlu1 %v1289_v1, %s1087_s29  ;;  %291 = vrot.lane.b32.xlu0 %v1289_v1, %s1088_s19  ;;  %v338_v20 = vsub.s32 2, %v1322_v6  ;;  %v357_v21 = vsub.s32 3, %v1322_v6  ;;  %vm333_vm2 = vcmp.lt.s32.totalorder %v1324_v7, 15  ;;  %vm352_vm3 = vcmp.lt.s32.totalorder %v1324_v7, 1 }
  0x5b   : > { %v1335_v14 = vrot.slane %v1328_v10, %v319_v8  ;;  %v1338_v15 = vrot.slane %v1328_v10, %v300_v9  ;;  %v1341_v16 = vrot.slane %v1330_v11, %v300_v9  ;;  %v1344_v17 = vrot.slane %v1330_v11, %v319_v8 }
  0x5c   : > { %v378_v34 = vsub.s32 5, %v1322_v6  ;;  %v1364_v35 = vrot.slane %v1328_v10, %v338_v20  ;;  %v1367_v36 = vrot.slane %v1330_v11, %v338_v20  ;;  %v1370_v37 = vrot.slane %v1328_v10, %v357_v21 }
  0x5d   : > { %v1373_v38 = vrot.slane %v1330_v11, %v357_v21  ;;  %vm373_vm4 = vcmp.lt.s32.totalorder %v1324_v7, 127  ;;  %v397_v57 = vsub.s32 6, %v1322_v6  ;;  %v416_v60 = vsub.s32 7, %v1322_v6 }
  0x5e   : > { %331 = vrot.lane.b32.xlu1 %v1289_v1, %s1089_s27  ;;  %329 = vrot.lane.b32.xlu0 %v1283_v0, %s1089_s27  ;;  %v1385_v45 = vrot.slane %v1328_v10, %v378_v34  ;;  %v1388_v46 = vrot.slane %v1330_v11, %v378_v34  ;;  %vm392_vm5 = vcmp.lt.s32.totalorder %v1324_v7, 113  ;;  %vm411_vm6 = vcmp.lt.s32.totalorder %v1324_v7, 112 }
  0x5f   : > { %v1406_v3 = vrot.slane %v1328_v10, %v397_v57  ;;  %v1413_v5 = vrot.slane %v1328_v10, %v416_v60  ;;  %v1416_v6 = vrot.slane %v1330_v11, %v416_v60  ;;  %vm430_vm7 = vcmp.lt.s32.totalorder %v1324_v7, 111 }
  0x62   : > { %350 = vrot.lane.b32.xlu1 %v1289_v1, %s1090_s10  ;;  %348 = vrot.lane.b32.xlu0 %v1283_v0, %s1090_s10 }
  0x66   : > { %371 = vrot.lane.b32.xlu1 %v1289_v1, %s1091_s11  ;;  %369 = vrot.lane.b32.xlu0 %v1283_v0, %s1091_s11 }
  0x6a   : > { %390 = vrot.lane.b32.xlu1 %v1289_v1, %s1092_s20  ;;  %388 = vrot.lane.b32.xlu0 %v1283_v0, %s1092_s20 }
  0x6e   : > { %409 = vrot.lane.b32.xlu1 %v1289_v1, %s1095_s8  ;;  %407 = vrot.lane.b32.xlu0 %v1283_v0, %s1095_s8 }
  0x72   : > { %428 = vrot.lane.b32.xlu1 %v1289_v1, %s1096_s15  ;;  %426 = vrot.lane.b32.xlu0 %v1283_v0, %s1096_s15 }
  0x76   : > { %467 = vperm.xlu0 %952, %v464_v4   ;;  %v1409_v4 = vrot.slane %v1330_v11, %v397_v57 }
  0xc8   : > { %v311_v12 = vpop.permute.xlu1 %310  ;;  %v290_v13 = vpop.permute.xlu0 %289 }
  0xcc   : > { %v313_v18 = vpop.permute.xlu1 %312  ;;  %v292_v19 = vpop.permute.xlu0 %291 }
  0xcd   : > { %v315_v22 = vsel %vm314_vm0, %v311_v12, %v313_v18  ;;  %v316_v23 = vsel %vm314_vm0, %v313_v18, %v311_v12  ;;  %v296_v24 = vsel %vm295_vm1, %v290_v13, %v292_v19  ;;  %v297_v25 = vsel %vm295_vm1, %v292_v19, %v290_v13 }
  0xce   : > { %v325_v26 = vmul.f32 %v1335_v14, %v316_v23  ;;  %v306_v27 = vmul.f32 %v1338_v15, %v297_v25  ;;  %v307_v28 = vmul.f32 %v1341_v16, %v296_v24  ;;  %v326_v29 = vmul.f32 %v1344_v17, %v315_v22  ;;  %v1431_v22 = vld [vmem:[#allocation6 + $0x18] ss:$0 sm:$0xff]  ;;  %v1433_v25 = vld [vmem:[#allocation6 + $0x10] ss:$0 sm:$0xff] }
  0xd0   : > { %v332_v30 = vpop.permute.xlu1 %331  ;;  %v330_v31 = vpop.permute.xlu0 %329  ;;  %v851_v32 = vpack.c.bf16 %v326_v29, %v307_v28  ;;  %v853_v33 = vpack.c.bf16 %v325_v26, %v306_v27 }
  0xd1   : > { %v334_v39 = vsel %vm333_vm2, %v330_v31, %v332_v30  ;;  %v335_v40 = vsel %vm333_vm2, %v332_v30, %v330_v31 }
  0xd2   : > { %852 = vmatprep.subr.bf16.mxu0 %v851_v32  ;;  %v344_v47 = vmul.f32 %v1364_v35, %v335_v40  ;;  %v345_v48 = vmul.f32 %v1367_v36, %v334_v39  ;;  %v445_v32 = vld [vmem:[%s1581_s2] sm:$0xff] }
  0xd3   : > { %854 = vmatpush1.bf16.msra.mxu0 %v853_v33 }
  0xd4   : > { %v351_v41 = vpop.permute.xlu1 %350  ;;  %v349_v42 = vpop.permute.xlu0 %348 }
  0xd5   : > { %v353_v43 = vsel %vm352_vm3, %v349_v42, %v351_v41  ;;  %v354_v44 = vsel %vm352_vm3, %v351_v41, %v349_v42 }
  0xd6   : > { %v363_v49 = vmul.f32 %v1370_v37, %v354_v44  ;;  %v364_v50 = vmul.f32 %v1373_v38, %v353_v43  ;;  %v648_v44 = vld [vmem:[%s1584_s5] sm:$0xff] }
  0xd8   : > { %v372_v51 = vpop.permute.xlu1 %371  ;;  %v370_v52 = vpop.permute.xlu0 %369  ;;  %v855_v53 = vpack.c.bf16 %v364_v50, %v345_v48  ;;  %v857_v54 = vpack.c.bf16 %v363_v49, %v344_v47 }
  0xd9   : > { %v374_v55 = vsel %vm373_vm4, %v370_v52, %v372_v51  ;;  %v375_v56 = vsel %vm373_vm4, %v372_v51, %v370_v52 }
  0xda   : > { %v384_v58 = vmul.f32 %v1385_v45, %v374_v55  ;;  %v385_v59 = vmul.f32 %v1388_v46, %v375_v56  ;;  %856 = vmatprep.subr.bf16.mxu0 %v855_v53 }
  0xdb   : > { %858 = vmatpush1.bf16.msra.mxu0 %v857_v54 }
  0xdc   : > { %v391_v61 = vpop.permute.xlu1 %390  ;;  %v389_v62 = vpop.permute.xlu0 %388  ;;  %v859_v63 = vpack.c.bf16 %v385_v59, %v1289_v1  ;;  %v861_v2 = vpack.c.bf16 %v384_v58, %v1283_v0 }
  0xdd   : > { %v393_v8 = vsel %vm392_vm5, %v389_v62, %v391_v61  ;;  %v394_v9 = vsel %vm392_vm5, %v391_v61, %v389_v62 }
  0xde   : > { %860 = vmatprep.subr.bf16.mxu0 %v859_v63  ;;  %v403_v10 = vmul.f32 %v1406_v3, %v393_v8  ;;  %v404_v11 = vmul.f32 %v1409_v4, %v394_v9 }
  0xdf   : > { %862 = vmatpush1.bf16.msra.mxu0 %v861_v2 }
  0xe0   : > { %v410_v12 = vpop.permute.xlu1 %409  ;;  %v408_v13 = vpop.permute.xlu0 %407 }
  0xe1   : > { %v412_v18 = vsel %vm411_vm6, %v408_v13, %v410_v12  ;;  %v413_v19 = vsel %vm411_vm6, %v410_v12, %v408_v13 }
  0xe2   : > { %v422_v20 = vmul.f32 %v1413_v5, %v412_v18  ;;  %v423_v21 = vmul.f32 %v1416_v6, %v413_v19 }
  0xe4   : > { %v429_v23 = vpop.permute.xlu1 %428  ;;  %v863_v24 = vpack.c.bf16 %v423_v21, %v404_v11  ;;  %v427_v26 = vpop.permute.xlu0 %426  ;;  %v865_v27 = vpack.c.bf16 %v422_v20, %v403_v10 }
  0xe5   : > { %v431_v28 = vsel %vm430_vm7, %v427_v26, %v429_v23  ;;  %v432_v29 = vsel %vm430_vm7, %v429_v23, %v427_v26 }
  0xe6   : > { %864 = vmatprep.subr.bf16.mxu0 %v863_v24  ;;  %v442_v30 = vmul.f32 %v1431_v22, %v432_v29  ;;  %v441_v31 = vmul.f32 %v1433_v25, %v431_v28 }
  0xe7   : > { %866 = vmatpush1.bf16.msra.mxu0 %v865_v27 }
  0xe8   : > { %490 = vmatprep.subr.mxu0 %v442_v30 }
  0xeb   : > { %491 = vmatpush1.msra.mxu0 %v441_v31 }
  0xec   : > { %842 = vmatmul.mubr.msk.f32.vlgmr.msra.gmra.mrb[0].mxu0 %vm470_vm8, %v445_v32 }
  0xf5   : > { %v468_v33 = vpop.permute.xlu0 %467 }
 0x1bf   : > { %v540_v34 = vpop.f32.mrb[0].mxu0 }
 0x1c0   : > { %v541_v39 = vadd.f32 %v540_v34, %v468_v33  ;;  %v542_v40 = vpop.f32.mrb[1].mxu0 }
 0x1c1   : > { %v543_v42 = vadd.f32 %v542_v40, %v468_v33 }
 0x1c2   : > { %v1445_v41 = vmax.f32 %v541_v39, 0.0 }
 0x1c3   : > { %v546_v43 = vmax.f32 %v543_v42, 0.0 }
 0x1c4   : > { %557 = vrot.lane.b32.xlu0 %v1445_v41, %s1087_s29  ;;  %547 = vrot.lane.b32.xlu1 %v1445_v41, %s1088_s19 }
 0x1c8   : > { %567 = vrot.lane.b32.xlu0 %v1445_v41, %s1089_s27  ;;  %549 = vrot.lane.b32.xlu1 %v546_v43, %s1088_s19 }
 0x1cc   : > { %577 = vrot.lane.b32.xlu0 %v1445_v41, %s1090_s10  ;;  %559 = vrot.lane.b32.xlu1 %v546_v43, %s1087_s29 }
 0x1d0   : > { %589 = vrot.lane.b32.xlu0 %v1445_v41, %s1091_s11  ;;  %569 = vrot.lane.b32.xlu1 %v546_v43, %s1089_s27 }
 0x1d4   : > { %599 = vrot.lane.b32.xlu0 %v1445_v41, %s1092_s20  ;;  %579 = vrot.lane.b32.xlu1 %v546_v43, %s1090_s10  ;;  %s850_s10 = sshll.u32 %s1154_s25, 8  ;;  %s735_s25 = scalar_lea.sflag [#allocation5], %s1269_s26 }
 0x1d5   : > { %s1535_s18 = scalar_lea.hbm %s1585_s6, %s850_s10 }
 0x1d8   : > { %609 = vrot.lane.b32.xlu0 %v1445_v41, %s1095_s8  ;;  %591 = vrot.lane.b32.xlu1 %v546_v43, %s1091_s11  ;;  %s282_s11 = scalar_lea.vmem [#allocation8], %s837_s12  ;;  %s1097_s12 = smov [#allocation8]  }
 0x1d9   : > { %s1015_s30 = sshll.u32 %s1097_s12, 4  ;;  %s1016_s30 = int_to_ptr.vmem [resolvable:$false] %s1015_s30 }
 0x1da   : > { %s1017_s16 = scalar_lea.vmem %s1016_s30, 512 }
 0x1dc   : > { %619 = vrot.lane.b32.xlu0 %v1445_v41, %s1096_s15  ;;  %601 = vrot.lane.b32.xlu1 %v546_v43, %s1092_s20  ;;  %s749_s20 = sshll.u32 %s282_s11, 4  ;;  %s1537_s20 = int_to_ptr.vmem [resolvable:$true] %s749_s20 }
 0x1dd   : > { %s1011_s7 = scalar_lea.vmem %s1537_s20, 256  ;;  %p1018_p10 = scmp.lt.s32.totalorder %s1537_s20, %s1016_s30 }
 0x1de   : > { %p1012_p4 = scmp.ne.s32.totalorder %s1537_s20, %s1011_s7  ;;  %p1019_p13 = scmp.lt.s32.totalorder %s1017_s16, %s1011_s7 }
 0x1e0   : > { %651 = vperm.xlu0 %952, %v648_v44   ;;  %611 = vrot.lane.b32.xlu1 %v546_v43, %s1095_s8  ;;  %p1013_p6 = pnand %p1012_p4, %p1224_p12  ;;  %p1020_p3 = por %p1019_p13, %p1018_p10 }
 0x1e2   : > { %p1014_p8 = pneg %p1013_p6 }
 0x1e4   : > { %621 = vrot.lane.b32.xlu1 %v546_v43, %s1096_s15  ;;  %p1021_p7 = pnand %p1020_p3, %p1014_p8 }
 0x236   : > { %v558_v47 = vpop.permute.xlu0 %557  ;;  %v548_v48 = vpop.permute.xlu1 %547 }
 0x23a   : > { %v568_v49 = vpop.permute.xlu0 %567  ;;  %v550_v50 = vpop.permute.xlu1 %549 }
 0x23b   : > { %v551_v51 = vsel %vm295_vm1, %v548_v48, %v550_v50  ;;  %v552_v52 = vsel %vm295_vm1, %v550_v50, %v548_v48 }
 0x23c   : > { %v553_v57 = vmul.f32 %v552_v52, %v1338_v15  ;;  %v554_v59 = vmul.f32 %v551_v51, %v1341_v16 }
 0x23e   : > { %v578_v53 = vpop.permute.xlu0 %577  ;;  %v560_v54 = vpop.permute.xlu1 %559 }
 0x23f   : > { %v561_v55 = vsel %vm314_vm0, %v558_v47, %v560_v54  ;;  %v562_v56 = vsel %vm314_vm0, %v560_v54, %v558_v47 }
 0x240   : > { %v563_v58 = vmul.f32 %v562_v56, %v1335_v14  ;;  %v564_v60 = vmul.f32 %v561_v55, %v1344_v17 }
 0x242   : > { %v570_v61 = vpop.permute.xlu1 %569  ;;  %v867_v62 = vpack.c.bf16 %v564_v60, %v554_v59  ;;  %v869_v63 = vpack.c.bf16 %v563_v58, %v553_v57  ;;  %v590_v2 = vpop.permute.xlu0 %589 }
 0x243   : > { %v571_v8 = vsel %vm333_vm2, %v568_v49, %v570_v61  ;;  %v572_v9 = vsel %vm333_vm2, %v570_v61, %v568_v49 }
 0x244   : > { %868 = vmatprep.subr.bf16.mxu1 %v867_v62  ;;  %v573_v16 = vmul.f32 %v572_v9, %v1364_v35  ;;  %v574_v17 = vmul.f32 %v571_v8, %v1367_v36 }
 0x245   : > { %870 = vmatpush1.bf16.msra.mxu1 %v869_v63 }
 0x246   : > { %v580_v12 = vpop.permute.xlu1 %579  ;;  %v600_v19 = vpop.permute.xlu0 %599 }
 0x247   : > { %v581_v14 = vsel %vm352_vm3, %v578_v53, %v580_v12  ;;  %v582_v15 = vsel %vm352_vm3, %v580_v12, %v578_v53 }
 0x248   : > { %v583_v13 = vmul.f32 %v582_v15, %v1370_v37  ;;  %v584_v18 = vmul.f32 %v581_v14, %v1373_v38 }
 0x24a   : > { %v592_v10 = vpop.permute.xlu1 %591  ;;  %v871_v11 = vpack.c.bf16 %v584_v18, %v574_v17  ;;  %v873_v20 = vpack.c.bf16 %v583_v13, %v573_v16  ;;  %v610_v26 = vpop.permute.xlu0 %609 }
 0x24b   : > { %v593_v21 = vsel %vm373_vm4, %v590_v2, %v592_v10  ;;  %v594_v23 = vsel %vm373_vm4, %v592_v10, %v590_v2 }
 0x24c   : > { %v595_v24 = vmul.f32 %v593_v21, %v1385_v45  ;;  %v596_v35 = vmul.f32 %v594_v23, %v1388_v46  ;;  %872 = vmatprep.subr.bf16.mxu1 %v871_v11 }
 0x24d   : > { %874 = vmatpush1.bf16.msra.mxu1 %v873_v20 }
 0x24e   : > { %v602_v36 = vpop.permute.xlu1 %601  ;;  %v875_v37 = vpack.c.bf16 %v596_v35, %v546_v43  ;;  %v877_v38 = vpack.c.bf16 %v595_v24, %v1445_v41  ;;  %v620_v34 = vpop.permute.xlu0 %619 }
 0x24f   : > { %v603_v27 = vsel %vm392_vm5, %v600_v19, %v602_v36  ;;  %v604_v28 = vsel %vm392_vm5, %v602_v36, %v600_v19 }
 0x250   : > { %876 = vmatprep.subr.bf16.mxu1 %v875_v37  ;;  %v605_v30 = vmul.f32 %v603_v27, %v1406_v3  ;;  %v606_v31 = vmul.f32 %v604_v28, %v1409_v4 }
 0x251   : > { %878 = vmatpush1.bf16.msra.mxu1 %v877_v38 }
 0x252   : > { %v612_v29 = vpop.permute.xlu1 %611 }
 0x253   : > { %v613_v45 = vsel %vm411_vm6, %v610_v26, %v612_v29  ;;  %v614_v46 = vsel %vm411_vm6, %v612_v29, %v610_v26 }
 0x254   : > { %v615_v32 = vmul.f32 %v613_v45, %v1413_v5  ;;  %v616_v33 = vmul.f32 %v614_v46, %v1416_v6  ;;  %v629_v5 = vld [vmem:[%s1583_s4] sm:$0xff] }
 0x256   : > { %v622_v39 = vpop.permute.xlu1 %621  ;;  %v879_v40 = vpack.c.bf16 %v616_v33, %v606_v31  ;;  %v881_v41 = vpack.c.bf16 %v615_v32, %v605_v30 }
 0x257   : > { %v624_v42 = vsel %vm430_vm7, %v622_v39, %v620_v34  ;;  %v623_v43 = vsel %vm430_vm7, %v620_v34, %v622_v39 }
 0x258   : > { %v626_v3 = vmul.f32 %v1431_v22, %v624_v42  ;;  %880 = vmatprep.subr.bf16.mxu1 %v879_v40  ;;  %v625_v4 = vmul.f32 %v1433_v25, %v623_v43 }
 0x259   : > { %882 = vmatpush1.bf16.msra.mxu1 %v881_v41 }
 0x25a   : > { %673 = vmatprep.subr.mxu1 %v626_v3 }
 0x25d   : > { %674 = vmatpush1.msra.mxu1 %v625_v4 }
 0x25e   : > { %843 = vmatmul.mubr.msk.f32.vlgmr.msra.gmra.mrb[0].mxu1 %vm470_vm8, %v629_v5 }
 0x25f   : > { %v652_v6 = vpop.permute.xlu0 %651 }
 0x331   : > { %v723_v7 = vpop.f32.mrb[0].mxu1 }
 0x332   : > { %v724_v44 = vadd.f32 %v723_v7, %v652_v6  ;;  %v725_v47 = vpop.f32.mrb[1].mxu1 }
 0x333   : > { %v726_v48 = vadd.f32 %v725_v47, %v652_v6 }
 0x334   : > { %v728_v22 = vadd.f32 %v724_v44, %v1283_v0 }
 0x335   : > { %v729_v25 = vadd.f32 %v726_v48, %v1289_v1 }
 0x336   : > { %v730_v49 = vmax.f32 %v728_v22, 0.0 }
 0x337   : > { %v731_v50 = vmax.f32 %v729_v25, 0.0 }
 0x338   : > { %732 = vst [vmem:[%s282_s11] sm:$0xff] %v730_v49 }
 0x339   : > { %733 = vst [vmem:[%s282_s11 + $0x8] sm:$0xff] %v731_v50 }
 0x33a   : > { %1024 = shalt.err (!%p1021_p7)
}
 0x33b   : > { %s1025_s26 = scalar_lea.hbm %s1535_s18, 256  ;;  %s1029_s19 = scalar_lea.hbm %s1585_s6, 512 }
 0x33c   : > { %p1026_p9 = scmp.ne.s32.totalorder %s1535_s18, %s1025_s26  ;;  %p1030_p0 = scmp.lt.u32.totalorder %s1535_s18, %s1585_s6 }
 0x33d   : > { %p1031_p11 = scmp.lt.u32.totalorder %s1029_s19, %s1025_s26  ;;  %p1033_p4 = scmp.lt.u32.totalorder %s1025_s26, %s1535_s18 }
 0x33e   : > { %p1027_p2 = pnand %p1026_p9, %p1224_p12 }
 0x33f   : > { %p1032_p1 = por %p1031_p11, %p1030_p0 }
 0x340   : > { %p1028_p5 = pneg %p1027_p2 }
 0x341   : > { %p1034_p6 = por %p1033_p4, %p1032_p1 }
 0x343   : > { %p1035_p8 = pnand %p1034_p6, %p1028_p5 }
 0x345   : > { %1038 = shalt.err (!%p1035_p8)
}
 0x346   : > { %889 = dma.vmem_to_hbm [thread:$0]  (%p1224_p12), %s1537_s20, 256, %s1535_s18, %s735_s25  }
 0x347 PF: > { %s761_s11 = sand.u32 1, %s1069_s21   ;;  %p1600_p10 = scmp.ne.s32.totalorder %s1590_s28, 0 }
 0x348   : > { %p1601_p13 = scmp.ge.s32.totalorder %s1081_s24, 2  ;;  %s762_s8 = scalar_lea.sflag [#allocation5], %s761_s11 }
 0x34a   : > { %p900_p3 = pnand %p1601_p13, %p1600_p10 }
 0x34c   : > { %1064 = dma.done.wait (!%p900_p3), %s762_s8, 256  }
 0x34d   : > { %1066 = vsyncadd (!%p900_p3), %s762_s8, 4294967040  ;;  %p20_p7 = scmp.ge.s32.totalorder %s1189_s9, 4   ;;  %s1602_s21 = smov %s1073_s22 }
 0x34e   : > { %s1603_s22 = smov %s1077_s23  ;;  %s1604_s23 = smov %s1220_s13 }
 0x34f   : > { %s1605_s24 = smov %s1189_s9  ;;  %22 = sbr.rel (!%p20_p7) target bundleno = 6 (0x6), region = 93 }
 0x356   :  { %767 = vsyncpa [#allocation4], 1 }
 0x357   :  { %769 = vsyncpa [#allocation4 + $0x1], 1 }
 0x358   :  { %770 = vsyncpa [#allocation7], 1 }
 0x359   :  { %771 = vsyncpa [#allocation5], 1 }
 0x35a   :  { %773 = vsyncpa [#allocation5 + $0x1], 1 }

</bundles_post_ra>
